<compile_context>
chip_gen: v7x
topology: tpu7x:2x2x1
jax: 0.10.0
libtpu: 0.0.40
codegen_flags: <defaults>
</compile_context>

<pallas_src>
import functools
import math

import jax
import jax.numpy as jnp
from jax import lax
from jax.experimental import pallas as pl
from jax.experimental.pallas import tpu as pltpu


def _round_up(x: int, m: int) -> int:
    return ((x + m - 1) // m) * m


def _vmem_limit_bytes() -> int:
    """Generation-aware VMEM budget (conservative on v7x's 64 MiB)."""
    try:
        cap = pltpu.get_tpu_info().vmem_capacity_bytes
        return int(min(cap * 3 // 4, 100 * 1024 * 1024))
    except Exception:
        return 32 * 1024 * 1024


def _pick_row_tile(rows: int) -> int:
    """Largest bf16-friendly row tile that divides `rows` (else full rows)."""
    for t in (512, 256, 128, 64, 32, 16):
        if rows >= t and rows % t == 0:
            return t
    return rows


# ---------------------------------------------------------------------------
# Kernel 1: fused QKV projection over (B*T_p) rows, single GEMM against the
# concatenated (d_in_p, 3*d_out_p) weight.
# ---------------------------------------------------------------------------
def _qkv_proj_kernel(x_ref, w_ref, q_ref, k_ref, v_ref, *, scale: float,
                     d_out_p: int):
    x = x_ref[...]                                              # (tr, d_in_p) bf16
    qkv = jnp.dot(x, w_ref[...], preferred_element_type=jnp.float32)
    # Fold 1/sqrt(head_dim) into Q once (O(T*d_out)) instead of scaling every
    # (tq, tk) score tile.  Slices are 128-aligned (d_out_p % 128 == 0).
    q_ref[...] = (qkv[:, :d_out_p] * scale).astype(q_ref.dtype)
    k_ref[...] = qkv[:, d_out_p:2 * d_out_p].astype(k_ref.dtype)
    v_ref[...] = qkv[:, 2 * d_out_p:3 * d_out_p].astype(v_ref.dtype)
    # TODO(synk): add a d_in (K) grid reduction axis + d_out tiling for large
    # d_model; the resident concatenated weight does not scale past ~4k.


# ---------------------------------------------------------------------------
# Kernel 2: flash-style causal attention + fused per-head output projection.
# grid = (B, nq, nk); kv axis is the reduction ("arbitrary"); tq == tk so the
# K/V index_map clamp suppresses DMA of above-diagonal blocks.
# ---------------------------------------------------------------------------
def _flash_attn_kernel(q_ref, k_ref, v_ref, wo_ref, bo_ref, o_ref,
                       m_scr, l_scr, acc_scr, *,
                       num_heads: int, head_dim: int, head_dim_p: int,
                       tq: int, tk: int):
    qi = pl.program_id(1)
    ki = pl.program_id(2)
    nk = pl.num_programs(2)

    @pl.when(ki == 0)
    def _init():
        m_scr[...] = jnp.full_like(m_scr, -jnp.inf)
        l_scr[...] = jnp.zeros_like(l_scr)
        acc_scr[...] = jnp.zeros_like(acc_scr)

    def _update(masked: bool):
        q = q_ref[0]                                            # (tq, d_out_p) bf16, pre-scaled
        k = k_ref[0]                                            # (tk, d_out_p) bf16
        v = v_ref[0]

        if masked:
            # tq == tk and ki == qi  =>  local iota mask == global causal mask.
            # Also masks zero-padded key positions (col >= T) for real queries.
            causal = (lax.broadcasted_iota(jnp.int32, (tq, tk), 1) >
                      lax.broadcasted_iota(jnp.int32, (tq, tk), 0))

        pad = head_dim_p - head_dim
        if pad > 0:
            v_pad_zeros = jnp.zeros((tk, pad), v.dtype)         # hoisted out of head loop

        # Static head loop with static slices (robust lowering).
        # TODO(synk): for num_heads >= 8 switch to lax.fori_loop(unroll=True)
        # with pl.ds slices to bound vreg live ranges.
        for h in range(num_heads):
            sl = slice(h * head_dim, (h + 1) * head_dim)
            qh, kh = q[:, sl], k[:, sl]
            # Contract trailing head_dim of both operands -> MXU, no transpose.
            s = lax.dot_general(qh, kh, (((1,), (1,)), ((), ())),
                                preferred_element_type=jnp.float32)   # (tq, tk)
            if masked:
                s = jnp.where(causal, -jnp.inf, s)              # already scaled via q

            m_old = m_scr[h]                                    # (tq, 1) f32
            m_new = jnp.maximum(m_old, jnp.max(s, axis=-1, keepdims=True))
            alpha = jnp.exp(m_old - m_new)
            p = jnp.exp(s - m_new)                              # f32 softmax math
            l_scr[h] = alpha * l_scr[h] + jnp.sum(p, axis=-1, keepdims=True)

            vh = v[:, sl]                                       # (tk, head_dim)
            if pad > 0:
                vh = jnp.concatenate([vh, v_pad_zeros], axis=1)  # (tk, head_dim_p), exact
            pv = jnp.dot(p.astype(vh.dtype), vh,
                         preferred_element_type=jnp.float32)    # (tq, head_dim_p)
            # Lane-dense (128-wide) accumulator RMW per head.
            acc_scr[h] = alpha * acc_scr[h] + pv
            m_scr[h] = m_new
        # TODO(synk): train-mode dropout on attention weights (eval -> identity).

    @pl.when(ki < qi)
    def _interior():
        _update(masked=False)

    @pl.when(ki == qi)
    def _diagonal():
        _update(masked=True)
    # ki > qi: compute skipped entirely; K/V DMA suppressed by the clamped
    # index_map.  TODO(synk): enumerate only lower-triangular (qi, ki) pairs
    # via a PrefetchScalarGridSpec index table to also drop the grid steps.

    @pl.when(ki == nk - 1)
    def _finalize():
        # Per-head normalize (EUP approx reciprocal, full-width) and per-head
        # output projection against zero-padded wo rows (exact), accumulated
        # into one lane-dense (tq, d_out_p) slab.
        out = bo_ref[...].astype(jnp.float32)                   # (1, d_out_p), broadcasts
        for h in range(num_heads):
            inv_l = pl.reciprocal(l_scr[h], approx=True)        # (tq, 1)
            ctx_h = (acc_scr[h] * inv_l).astype(wo_ref.dtype)   # (tq, head_dim_p) bf16
            out = out + jnp.dot(ctx_h, wo_ref[h],
                                preferred_element_type=jnp.float32)
        o_ref[0] = out.astype(o_ref.dtype)


def multihead_attention(x, wq, wk, wv, wo, bo, *, num_heads: int):
    """x: (B, T, d_in); wq/wk/wv: (d_in, d_out); wo: (d_out, d_out); bo: (1, d_out)."""
    B, T, d_in = x.shape
    d_out = wq.shape[1]
    assert d_out % num_heads == 0, "d_out must be divisible by num_heads"
    head_dim = d_out // num_heads
    head_dim_p = _round_up(head_dim, 128)       # lane-dense per-head accumulator slot
    scale = 1.0 / math.sqrt(head_dim)
    out_dtype = x.dtype

    # Lane-dense padding of model dims (zero pad rows/cols keeps math exact).
    d_in_p = _round_up(d_in, 128)
    d_out_p = _round_up(d_out, 128)

    # Sequence tiling: equal tq == tk (required for the causal DMA clamp);
    # pad T up to the tile instead of shrinking tiles below the bf16 minimum.
    tile_target = 256   # TODO(synk): generation-dependent targets (v5e smaller, v6e larger)
    if T >= tile_target:
        tq = tile_target
        T_p = _round_up(T, tq)
    else:
        tq = T
        T_p = T
    tk = tq
    nq = T_p // tq
    nk = T_p // tk

    bf16 = lambda a: a.astype(jnp.bfloat16)
    x_p = jnp.pad(x, ((0, 0), (0, T_p - T), (0, d_in_p - d_in)))
    wq_p = jnp.pad(wq, ((0, d_in_p - d_in), (0, d_out_p - d_out)))
    wk_p = jnp.pad(wk, ((0, d_in_p - d_in), (0, d_out_p - d_out)))
    wv_p = jnp.pad(wv, ((0, d_in_p - d_in), (0, d_out_p - d_out)))
    w_cat = bf16(jnp.concatenate([wq_p, wk_p, wv_p], axis=1))   # (d_in_p, 3*d_out_p)
    bo_p = jnp.pad(bo, ((0, 0), (0, d_out_p - d_out))).astype(jnp.float32)
    # Per-head output-projection weight, zero-padded to (H, head_dim_p, d_out_p).
    wo_heads = jnp.pad(
        wo.reshape(num_heads, head_dim, d_out),
        ((0, 0), (0, head_dim_p - head_dim), (0, d_out_p - d_out)))
    wo_heads = bf16(wo_heads)

    vmem_limit = _vmem_limit_bytes()

    # ---- Kernel 1: fused QKV projection (batch folded into rows) ------------
    rows = B * T_p
    tr = _pick_row_tile(rows)
    x2d = bf16(x_p).reshape(rows, d_in_p)
    qkv_out_spec = pl.BlockSpec((tr, d_out_p), lambda r: (r, 0))
    q2d, k2d, v2d = pl.pallas_call(
        functools.partial(_qkv_proj_kernel, scale=scale, d_out_p=d_out_p),
        out_shape=tuple(jax.ShapeDtypeStruct((rows, d_out_p), jnp.bfloat16)
                        for _ in range(3)),
        grid_spec=pltpu.PrefetchScalarGridSpec(
            num_scalar_prefetch=0,
            grid=(rows // tr,),
            in_specs=[pl.BlockSpec((tr, d_in_p), lambda r: (r, 0)),
                      pl.BlockSpec((d_in_p, 3 * d_out_p), lambda r: (0, 0))],
            out_specs=[qkv_out_spec, qkv_out_spec, qkv_out_spec],
        ),
        compiler_params=pltpu.CompilerParams(
            dimension_semantics=("parallel",),
            vmem_limit_bytes=vmem_limit),
    )(x2d, w_cat)

    q = q2d.reshape(B, T_p, d_out_p)
    k = k2d.reshape(B, T_p, d_out_p)
    v = v2d.reshape(B, T_p, d_out_p)

    # ---- Kernel 2: flash attention + fused output projection ----------------
    kernel = functools.partial(_flash_attn_kernel, num_heads=num_heads,
                               head_dim=head_dim, head_dim_p=head_dim_p,
                               tq=tq, tk=tk)
    # Clamp the kv block index to the diagonal: above-diagonal steps reuse the
    # previous block index, so Pallas suppresses the K/V copies.
    kv_spec = pl.BlockSpec((1, tk, d_out_p),
                           lambda b, i, j: (b, jnp.minimum(i, j), 0))
    # TODO(synk): on v7x / very large d_out, single-buffer wo (pipeline_mode)
    # or tile its N dimension to respect the 64 MiB VMEM budget.
    out_p = pl.pallas_call(
        kernel,
        out_shape=jax.ShapeDtypeStruct((B, T_p, d_out_p), out_dtype),
        grid_spec=pltpu.PrefetchScalarGridSpec(
            num_scalar_prefetch=0,
            grid=(B, nq, nk),
            in_specs=[
                pl.BlockSpec((1, tq, d_out_p), lambda b, i, j: (b, i, 0)),   # q
                kv_spec,                                                     # k
                kv_spec,                                                     # v
                pl.BlockSpec((num_heads, head_dim_p, d_out_p),
                             lambda b, i, j: (0, 0, 0)),                     # wo (per head)
                pl.BlockSpec((1, d_out_p), lambda b, i, j: (0, 0)),          # bo
            ],
            out_specs=pl.BlockSpec((1, tq, d_out_p), lambda b, i, j: (b, i, 0)),
            scratch_shapes=[
                pltpu.VMEM((num_heads, tq, 1), jnp.float32),          # running max m
                pltpu.VMEM((num_heads, tq, 1), jnp.float32),          # running sum l
                pltpu.VMEM((num_heads, tq, head_dim_p), jnp.float32),  # lane-dense acc
            ],
        ),
        compiler_params=pltpu.CompilerParams(
            dimension_semantics=("parallel", "parallel", "arbitrary"),
            vmem_limit_bytes=vmem_limit),
    )(q, k, v, wo_heads, bo_p)

    return out_p[:, :T, :d_out]


def _reference(x, wq, wk, wv, wo, bo, num_heads):
    """Pure-JAX f32 reference mirroring the PyTorch forward (eval mode)."""
    B, T, _ = x.shape
    d_out = wq.shape[1]
    head_dim = d_out // num_heads
    q = (x @ wq).reshape(B, T, num_heads, head_dim).transpose(0, 2, 1, 3)
    k = (x @ wk).reshape(B, T, num_heads, head_dim).transpose(0, 2, 1, 3)
    v = (x @ wv).reshape(B, T, num_heads, head_dim).transpose(0, 2, 1, 3)
    s = jnp.einsum('bhqd,bhkd->bhqk', q, k)
    mask = jnp.triu(jnp.ones((T, T), bool), k=1)
    s = jnp.where(mask, -jnp.inf, s)
    p = jax.nn.softmax(s / math.sqrt(head_dim), axis=-1)
    ctx = jnp.einsum('bhqk,bhkd->bhqd', p, v).transpose(0, 2, 1, 3).reshape(B, T, d_out)
    return ctx @ wo + bo


if __name__ == "__main__":
    B, T, d_in, d_out, num_heads = 2, 8, 32, 32, 4

    key = jax.random.PRNGKey(0)
    kx, kq, kk, kv, ko, kb = jax.random.split(key, 6)
    x = jax.random.normal(kx, (B, T, d_in), dtype=jnp.float32)
    # Weights stored pre-transposed (d_in, d_out): y = x @ W (+ b)
    wq = jax.random.normal(kq, (d_in, d_out), dtype=jnp.float32) * 0.1
    wk = jax.random.normal(kk, (d_in, d_out), dtype=jnp.float32) * 0.1
    wv = jax.random.normal(kv, (d_in, d_out), dtype=jnp.float32) * 0.1
    wo = jax.random.normal(ko, (d_out, d_out), dtype=jnp.float32) * 0.1
    bo = jax.random.normal(kb, (1, d_out), dtype=jnp.float32) * 0.1

    out = multihead_attention(x, wq, wk, wv, wo, bo, num_heads=num_heads)
    out = jax.block_until_ready(out)

    ref = _reference(x, wq, wk, wv, wo, bo, num_heads)
    assert out.shape == (B, T, d_out)
    # bf16 matmul operands (f32 accumulation) + approx reciprocal -> relaxed tol.
    assert jnp.allclose(out, ref, atol=3e-2, rtol=3e-2), "mismatch vs reference"
    print("KERNEL_OK")
</pallas_src>

<mosaic_0001>
module attributes {stable_mosaic.version = 11 : i64} {
  func.func @_qkv_proj_kernel(%arg0: i32, %arg1: memref<16x128xbf16, #tpu.memory_space<vmem>>, %arg2: memref<128x384xbf16, #tpu.memory_space<vmem>>, %arg3: memref<16x128xbf16, #tpu.memory_space<vmem>>, %arg4: memref<16x128xbf16, #tpu.memory_space<vmem>>, %arg5: memref<16x128xbf16, #tpu.memory_space<vmem>>) attributes {dimension_semantics = [#tpu.dimension_semantics<parallel>], iteration_bounds = array<i64: 1>, scalar_prefetch = 0 : i64, scratch_operands = 0 : i64, tpu.core_type = #tpu.core_type<tc>, window_params = [{transform_indices = @transform_0, window_bounds = array<i64: 16, 128>}, {pipeline_mode = #tpu.pipeline_mode<synchronous>, transform_indices = @transform_1, window_bounds = array<i64: 128, 384>}, {transform_indices = @transform_2, window_bounds = array<i64: 16, 128>}, {transform_indices = @transform_3, window_bounds = array<i64: 16, 128>}, {transform_indices = @transform_4, window_bounds = array<i64: 16, 128>}]} {
    %c0 = arith.constant 0 : index
    %c0_0 = arith.constant 0 : index
    %0 = vector.load %arg1[%c0, %c0_0] : memref<16x128xbf16, #tpu.memory_space<vmem>>, vector<16x128xbf16>
    %c0_1 = arith.constant 0 : index
    %c0_2 = arith.constant 0 : index
    %1 = vector.load %arg2[%c0_1, %c0_2] : memref<128x384xbf16, #tpu.memory_space<vmem>>, vector<128x384xbf16>
    %cst = arith.constant dense<0.000000e+00> : vector<16x384xf32>
    %2 = tpu.matmul %0, %1, %cst {dimension_numbers = #tpu.dot_dimension_numbers<[1], [0], [0], [1], [0, 0, 1, 1], [], []>} : vector<16x128xbf16>, vector<128x384xbf16>, vector<16x384xf32> -> vector<16x384xf32>
    %3 = vector.extract_strided_slice %2 {offsets = [0, 0], sizes = [16, 128], strides = [1, 1]} : vector<16x384xf32> to vector<16x128xf32>
    %cst_3 = arith.constant 0.353553385 : f32
    %4 = vector.broadcast %cst_3 : f32 to vector<16x128xf32>
    %5 = arith.mulf %3, %4 : vector<16x128xf32>
    %6 = arith.truncf %5 : vector<16x128xf32> to vector<16x128xbf16>
    %c0_4 = arith.constant 0 : index
    %c0_5 = arith.constant 0 : index
    %7 = vector.load %arg3[%c0_4, %c0_5] : memref<16x128xbf16, #tpu.memory_space<vmem>>, vector<16x128xbf16>
    tpu.vector_store %arg3[%c0_4, %c0_5], %6 {strides = array<i32>} : memref<16x128xbf16, #tpu.memory_space<vmem>>, vector<16x128xbf16>,
    %8 = vector.extract_strided_slice %2 {offsets = [0, 128], sizes = [16, 128], strides = [1, 1]} : vector<16x384xf32> to vector<16x128xf32>
    %9 = arith.truncf %8 : vector<16x128xf32> to vector<16x128xbf16>
    %c0_6 = arith.constant 0 : index
    %c0_7 = arith.constant 0 : index
    %10 = vector.load %arg4[%c0_6, %c0_7] : memref<16x128xbf16, #tpu.memory_space<vmem>>, vector<16x128xbf16>
    tpu.vector_store %arg4[%c0_6, %c0_7], %9 {strides = array<i32>} : memref<16x128xbf16, #tpu.memory_space<vmem>>, vector<16x128xbf16>,
    %11 = vector.extract_strided_slice %2 {offsets = [0, 256], sizes = [16, 128], strides = [1, 1]} : vector<16x384xf32> to vector<16x128xf32>
    %12 = arith.truncf %11 : vector<16x128xf32> to vector<16x128xbf16>
    %c0_8 = arith.constant 0 : index
    %c0_9 = arith.constant 0 : index
    %13 = vector.load %arg5[%c0_8, %c0_9] : memref<16x128xbf16, #tpu.memory_space<vmem>>, vector<16x128xbf16>
    tpu.vector_store %arg5[%c0_8, %c0_9], %12 {strides = array<i32>} : memref<16x128xbf16, #tpu.memory_space<vmem>>, vector<16x128xbf16>,
    return
  }
  func.func @transform_0(%arg0: i32) -> (i32, i32) {
    %c0_i32 = arith.constant 0 : i32
    %c0_i32_0 = arith.constant 0 : i32
    return %arg0, %c0_i32 : i32, i32
  }
  func.func @transform_1(%arg0: i32) -> (i32, i32) {
    %c0_i32 = arith.constant 0 : i32
    %c0_i32_0 = arith.constant 0 : i32
    %c0_i32_1 = arith.constant 0 : i32
    return %c0_i32, %c0_i32_0 : i32, i32
  }
  func.func @transform_2(%arg0: i32) -> (i32, i32) {
    %c0_i32 = arith.constant 0 : i32
    %c0_i32_0 = arith.constant 0 : i32
    return %arg0, %c0_i32 : i32, i32
  }
  func.func @transform_3(%arg0: i32) -> (i32, i32) {
    %c0_i32 = arith.constant 0 : i32
    %c0_i32_0 = arith.constant 0 : i32
    return %arg0, %c0_i32 : i32, i32
  }
  func.func @transform_4(%arg0: i32) -> (i32, i32) {
    %c0_i32 = arith.constant 0 : i32
    %c0_i32_0 = arith.constant 0 : i32
    return %arg0, %c0_i32 : i32, i32
  }
}

</mosaic_0001>

<bundles_post_ra>
// kernel: tpu_custom_call.1
= control target key start
LH: loop header
LB: loop body
LE: loop exit
PB: predicated region body
PF: predicated region fallthrough
CT: control target
= control target key end

     0   :  { %10 = vsyncpa [#allocation3], 0  ;;  %s745_s0 = inlined_call_operand.hbm [shape: bf16[16,128], index: 0, kind: input, shape index: {}]   ;;  %s746_s1 = inlined_call_operand.hbm [shape: bf16[128,384], index: 1, kind: input, shape index: {}]   ;;  %s747_s2 = inlined_call_operand.hbm [shape: bf16[16,128], index: 2, kind: output, shape index: {0}]   ;;  %s748_s3 = inlined_call_operand.hbm [shape: bf16[16,128], index: 3, kind: output, shape index: {1}]   ;;  %s749_s4 = inlined_call_operand.hbm [shape: bf16[16,128], index: 4, kind: output, shape index: {2}]  }
   0x1   :  { %11 = vsyncpa [#allocation6], 0 }
   0x2   :  { %12 = vsyncpa [#allocation4], 0 }
   0x3   :  { %13 = vsyncpa [#allocation9], 0  ;;  %s622_s15 = smov [#allocation2]   ;;  %s504_s19 = scalar_lea.hbm %s745_s0, 128 }
   0x4   :  { %s19_s16 = sshll.u32 %s622_s15, 4  ;;  %p505_p0 = scmp.ne.s32.totalorder %s745_s0, %s504_s19  ;;  %s20_s16 = int_to_ptr.vmem [resolvable:$true] %s19_s16 }
   0x5   :  { %p508_p1 = scmp.lt.u32.totalorder %s504_s19, %s745_s0 }
   0x7   :  { %p510_p2 = pnand %p508_p1, %p505_p0 }
   0x9   :  { %513 = shalt.err (!%p510_p2)
}
   0xa   :  { %s514_s24 = scalar_lea.vmem %s20_s16, 128  ;;  %p519_p4 = scmp.lt.s32.totalorder %s20_s16, %s20_s16 }
   0xb   :  { %p515_p3 = scmp.ne.s32.totalorder %s20_s16, %s514_s24  ;;  %p520_p5 = scmp.lt.s32.totalorder %s514_s24, %s514_s24 }
   0xd   :  { %p521_p6 = por %p520_p5, %p519_p4 }
   0xf   :  { %p522_p7 = pnand %p521_p6, %p515_p3 }
  0x11   :  { %525 = shalt.err (!%p522_p7)
}
  0x12   :  { %s623_s25 = smov 64   ;;  %s624_s26 = smov 4  }
  0x13   :  { %25 = dma.hbm_to_vmem [thread:$0]  %s745_s0, 128, %s20_s16, [#allocation3], %s623_s25, %s623_s25, %s624_s26  }
  0x14   :  { %s625_s29 = smov [#allocation5]   ;;  %s526_s7 = scalar_lea.hbm %s746_s1, 3072 }
  0x15   :  { %s31_s30 = sshll.u32 %s625_s29, 4  ;;  %p527_p8 = scmp.ne.s32.totalorder %s746_s1, %s526_s7  ;;  %s32_s30 = int_to_ptr.vmem [resolvable:$true] %s31_s30 }
  0x16   :  { %p530_p9 = scmp.lt.u32.totalorder %s526_s7, %s746_s1 }
  0x18   :  { %p532_p10 = pnand %p530_p9, %p527_p8 }
  0x1a   :  { %535 = shalt.err (!%p532_p10)
}
  0x1b   :  { %s536_s12 = scalar_lea.vmem %s32_s30, 3072  ;;  %p541_p12 = scmp.lt.s32.totalorder %s32_s30, %s32_s30 }
  0x1c   :  { %p537_p11 = scmp.ne.s32.totalorder %s32_s30, %s536_s12  ;;  %p542_p13 = scmp.lt.s32.totalorder %s536_s12, %s536_s12 }
  0x1e   :  { %p543_p0 = por %p542_p13, %p541_p12 }
  0x20   :  { %p544_p1 = pnand %p543_p0, %p537_p11 }
  0x22   :  { %547 = shalt.err (!%p544_p1)
}
  0x23   :  { %s626_s0 = smov 192   ;;  %s627_s13 = smov 12  }
  0x24   :  { %37 = dma.hbm_to_vmem [thread:$0]  %s746_s1, 3072, %s32_s30, [#allocation6], %s626_s0, %s626_s0, %s627_s13  }
  0x25   :  { %614 = dma.done.wait [#allocation3], 128  }
  0x26   :  { %615 = vsyncadd [#allocation3], 4294967168 }
  0x27   :  { %616 = dma.done.wait [#allocation6], 3072  }
  0x28   :  { %617 = vsyncadd [#allocation6], 4294964224  ;;  %v628_v0 = vmov 0.0   ;;  %vm629_vm0 = vmmov 0   ;;  %v630_v1 = vmov 0   ;;  %v503_v26 = vld [vmem:[#allocation2] sm:$0xff]  }
  0x29   :  { %439 = vmatprep.subr.bf16.mxu1 %v628_v0  ;;  %455 = vmatprep.mubr.msk.bf16.mxu1 %vm629_vm0, %v628_v0  ;;  %v471_v2 = vld [vmem:[#allocation5 + $0x4] ss:$12 sps:$4 sm:$0xff]   ;;  %v473_v3 = vld [vmem:[#allocation5 + $0x8] ss:$12 sps:$4 sm:$0xff]   ;;  %v474_v4 = vld [vmem:[#allocation5] ss:$12 sps:$4 sm:$0xff]  }
  0x2a   :  { %245 = vmatprep.mubr.bf16.mxu0 %v630_v1  ;;  %213 = vmatprep.subr.bf16.mxu0 %v471_v2  ;;  %v475_v5 = vld [vmem:[#allocation5 + $0x1c] ss:$12 sps:$4 sm:$0xff]   ;;  %v477_v6 = vld [vmem:[#allocation5 + $0x20] ss:$12 sps:$4 sm:$0xff]   ;;  %v478_v7 = vld [vmem:[#allocation5 + $0x18] ss:$12 sps:$4 sm:$0xff]  }
  0x2b   :  { %440 = vmatpush3.bf16.msra.mxu1 %v473_v3  ;;  %214 = vmatpush1.bf16.msra.mxu0 %v474_v4  ;;  %v479_v8 = vld [vmem:[#allocation5 + $0x34] ss:$12 sps:$4 sm:$0xff]   ;;  %v481_v9 = vld [vmem:[#allocation5 + $0x38] ss:$12 sps:$4 sm:$0xff]   ;;  %v482_v10 = vld [vmem:[#allocation5 + $0x30] ss:$12 sps:$4 sm:$0xff]  }
  0x2c   :  { %441 = vmatprep.subr.bf16.mxu1 %v628_v0  ;;  %215 = vmatprep.subr.bf16.mxu0 %v475_v5  ;;  %v483_v11 = vld [vmem:[#allocation5 + $0x4c] ss:$12 sps:$4 sm:$0xff]   ;;  %v485_v12 = vld [vmem:[#allocation5 + $0x50] ss:$12 sps:$4 sm:$0xff]   ;;  %v486_v13 = vld [vmem:[#allocation5 + $0x48] ss:$12 sps:$4 sm:$0xff]  }
  0x2d   :  { %v487_v14 = vld [vmem:[#allocation5 + $0x64] ss:$12 sps:$4 sm:$0xff]   ;;  %v489_v15 = vld [vmem:[#allocation5 + $0x68] ss:$12 sps:$4 sm:$0xff]   ;;  %v490_v16 = vld [vmem:[#allocation5 + $0x60] ss:$12 sps:$4 sm:$0xff]  }
  0x2e   :  { %v491_v17 = vld [vmem:[#allocation5 + $0x7c] ss:$12 sps:$4 sm:$0xff]   ;;  %v493_v18 = vld [vmem:[#allocation5 + $0x80] ss:$12 sps:$4 sm:$0xff]   ;;  %v494_v19 = vld [vmem:[#allocation5 + $0x78] ss:$12 sps:$4 sm:$0xff]  }
  0x2f   :  { %442 = vmatpush3.bf16.msra.mxu1 %v477_v6  ;;  %216 = vmatpush1.bf16.msra.mxu0 %v478_v7  ;;  %v495_v20 = vld [vmem:[#allocation5 + $0x94] ss:$12 sps:$4 sm:$0xff]   ;;  %v497_v21 = vld [vmem:[#allocation5 + $0x98] ss:$12 sps:$4 sm:$0xff]   ;;  %v498_v22 = vld [vmem:[#allocation5 + $0x90] ss:$12 sps:$4 sm:$0xff]  }
  0x30   :  { %443 = vmatprep.subr.bf16.mxu1 %v628_v0  ;;  %217 = vmatprep.subr.bf16.mxu0 %v479_v8  ;;  %v499_v23 = vld [vmem:[#allocation5 + $0xac] ss:$12 sps:$4 sm:$0xff]   ;;  %v501_v24 = vld [vmem:[#allocation5 + $0xb0] ss:$12 sps:$4 sm:$0xff]   ;;  %v502_v25 = vld [vmem:[#allocation5 + $0xa8] ss:$12 sps:$4 sm:$0xff]  }
  0x31   :  { %s631_s1 = smov [#allocation8]   ;;  %s632_s17 = smov [#allocation7]  }
  0x32   :  { %s346_s16 = sshll.u32 %s631_s1, 4  ;;  %s334_s18 = sshll.u32 %s632_s17, 4  ;;  %s347_s16 = int_to_ptr.vmem [resolvable:$true] %s346_s16  ;;  %s686_s18 = int_to_ptr.vmem [resolvable:$true] %s334_s18 }
  0x33   :  { %444 = vmatpush3.bf16.msra.mxu1 %v481_v9  ;;  %218 = vmatpush1.bf16.msra.mxu0 %v482_v10  ;;  %s633_s19 = smov [#allocation10]   ;;  %s548_s21 = scalar_lea.vmem %s347_s16, 128 }
  0x34   :  { %445 = vmatprep.subr.bf16.mxu1 %v628_v0  ;;  %219 = vmatprep.subr.bf16.mxu0 %v483_v11  ;;  %s358_s20 = sshll.u32 %s633_s19, 4  ;;  %p549_p2 = scmp.ne.s32.totalorder %s347_s16, %s548_s21  ;;  %s688_s20 = int_to_ptr.vmem [resolvable:$true] %s358_s20 }
  0x35   :  { %p553_p3 = scmp.lt.s32.totalorder %s347_s16, %s347_s16  ;;  %p554_p4 = scmp.lt.s32.totalorder %s548_s21, %s548_s21 }
  0x37   :  { %446 = vmatpush3.bf16.msra.mxu1 %v485_v12  ;;  %220 = vmatpush1.bf16.msra.mxu0 %v486_v13  ;;  %p555_p5 = por %p554_p4, %p553_p3 }
  0x38   :  { %447 = vmatprep.subr.bf16.mxu1 %v628_v0  ;;  %221 = vmatprep.subr.bf16.mxu0 %v487_v14 }
  0x39   :  { %p556_p6 = pnand %p555_p5, %p549_p2 }
  0x3b   :  { %448 = vmatpush3.bf16.msra.mxu1 %v489_v15  ;;  %222 = vmatpush1.bf16.msra.mxu0 %v490_v16 }
  0x3c   :  { %449 = vmatprep.subr.bf16.mxu1 %v628_v0  ;;  %223 = vmatprep.subr.bf16.mxu0 %v491_v17 }
  0x3f   :  { %450 = vmatpush3.bf16.msra.mxu1 %v493_v18  ;;  %224 = vmatpush1.bf16.msra.mxu0 %v494_v19 }
  0x40   :  { %451 = vmatprep.subr.bf16.mxu1 %v628_v0  ;;  %225 = vmatprep.subr.bf16.mxu0 %v495_v20 }
  0x43   :  { %452 = vmatpush3.bf16.msra.mxu1 %v497_v21  ;;  %226 = vmatpush1.bf16.msra.mxu0 %v498_v22 }
  0x44   :  { %453 = vmatprep.subr.bf16.mxu1 %v628_v0  ;;  %227 = vmatprep.subr.bf16.mxu0 %v499_v23 }
  0x47   :  { %454 = vmatpush3.bf16.msra.mxu1 %v501_v24  ;;  %228 = vmatpush1.bf16.msra.mxu0 %v502_v25 }
  0x4a   :  { %456 = vmatmul.mubr.bf16.vlgmr.msra.gmra.mrb[0].mxu1 %v503_v26  ;;  %246 = vmatmul.mubr.bf16.vlgmr.msra.gmra.mrb[0].mxu0 %v503_v26 }
 0x11d   :  { %v290_v27 = vpop.f32.mrb[0].mxu1  ;;  %v247_v28 = vpop.f32.mrb[0].mxu0 }
 0x11e   :  { %v457_v29 = vpop.f32.mrb[1].mxu1  ;;  %v249_v30 = vpop.f32.mrb[1].mxu0  ;;  %v297_v35 = vmul.f32 0.35355338, %v247_v28 }
 0x11f   :  { %v293_v31 = vpop.f32.mrb[2].mxu1  ;;  %v251_v33 = vpop.f32.mrb[2].mxu0 }
 0x120   :  { %v428_v32 = vpack.c.bf16 %v293_v31, %v290_v27  ;;  %v458_v34 = vpop.f32.mrb[3].mxu1  ;;  %v298_v36 = vmul.f32 0.35355338, %v251_v33  ;;  %v253_v37 = vpop.f32.mrb[3].mxu0 }
 0x121   :  { %v423_v38 = vpack.c.bf16 %v253_v37, %v249_v30 }
 0x122   :  { %429 = vst [vmem:[#allocation10] sm:$0xff] %v428_v32   ;;  %v418_v39 = vpack.c.bf16 %v298_v36, %v297_v35 }
 0x123   :  { %424 = vst [vmem:[#allocation8] sm:$0xff] %v423_v38  }
 0x124   :  { %419 = vst [vmem:[#allocation7] sm:$0xff] %v418_v39  }
 0x125   :  { %559 = shalt.err (!%p556_p6)
}
 0x126   :  { %s560_s24 = scalar_lea.hbm %s748_s3, 128 }
 0x127   :  { %p561_p7 = scmp.ne.s32.totalorder %s748_s3, %s560_s24  ;;  %p564_p8 = scmp.lt.u32.totalorder %s560_s24, %s748_s3 }
 0x129   :  { %p566_p9 = pnand %p564_p8, %p561_p7 }
 0x12b   :  { %569 = shalt.err (!%p566_p9)
}
 0x12c   :  { %352 = dma.vmem_to_hbm [thread:$0]  %s347_s16, 128, %s748_s3, [#allocation9], %s623_s25, %s623_s25, %s624_s26  }
 0x12d   :  { %s570_s7 = scalar_lea.vmem %s686_s18, 128  ;;  %p575_p11 = scmp.lt.s32.totalorder %s686_s18, %s686_s18 }
 0x12e   :  { %p571_p10 = scmp.ne.s32.totalorder %s686_s18, %s570_s7  ;;  %p576_p12 = scmp.lt.s32.totalorder %s570_s7, %s570_s7 }
 0x130   :  { %p577_p13 = por %p576_p12, %p575_p11 }
 0x132   :  { %p578_p0 = pnand %p577_p13, %p571_p10 }
 0x134   :  { %581 = shalt.err (!%p578_p0)
}
 0x135   :  { %s582_s10 = scalar_lea.hbm %s747_s2, 128 }
 0x136   :  { %p583_p1 = scmp.ne.s32.totalorder %s747_s2, %s582_s10  ;;  %p586_p2 = scmp.lt.u32.totalorder %s582_s10, %s747_s2 }
 0x138   :  { %p588_p3 = pnand %p586_p2, %p583_p1 }
 0x13a   :  { %591 = shalt.err (!%p588_p3)
}
 0x13b   :  { %340 = dma.vmem_to_hbm [thread:$0]  %s686_s18, 128, %s747_s2, [#allocation4], %s623_s25, %s623_s25, %s624_s26  }
 0x13c   :  { %s592_s15 = scalar_lea.vmem %s688_s20, 128  ;;  %p597_p5 = scmp.lt.s32.totalorder %s688_s20, %s688_s20 }
 0x13d   :  { %p593_p4 = scmp.ne.s32.totalorder %s688_s20, %s592_s15  ;;  %p598_p6 = scmp.lt.s32.totalorder %s592_s15, %s592_s15 }
 0x13f   :  { %p599_p7 = por %p598_p6, %p597_p5 }
 0x141   :  { %p600_p8 = pnand %p599_p7, %p593_p4 }
 0x143   :  { %603 = shalt.err (!%p600_p8)
}
 0x144   :  { %s604_s17 = scalar_lea.hbm %s749_s4, 128 }
 0x145   :  { %p605_p9 = scmp.ne.s32.totalorder %s749_s4, %s604_s17  ;;  %p608_p10 = scmp.lt.u32.totalorder %s604_s17, %s749_s4 }
 0x147   :  { %p610_p11 = pnand %p608_p10, %p605_p9 }
 0x149   :  { %613 = shalt.err (!%p610_p11)
}
 0x14a   :  { %364 = dma.vmem_to_hbm [thread:$0]  %s688_s20, 128, %s749_s4, [#allocation9], %s623_s25, %s623_s25, %s624_s26  }
 0x14b   :  { %618 = dma.done.wait [#allocation4], 128  }
 0x14c   :  { %619 = vsyncadd [#allocation4], 4294967168 }
 0x14d   :  { %620 = dma.done.wait [#allocation9], 256  }
 0x14e   :  { %621 = vsyncadd [#allocation9], 4294967040 }
 0x14f   :  { %374 = vsyncpa [#allocation3], 1 }
 0x150   :  { %375 = vsyncpa [#allocation6], 1 }
 0x151   :  { %376 = vsyncpa [#allocation4], 1 }
 0x152   :  { %377 = vsyncpa [#allocation9], 1 }

</bundles_post_ra>
